<compile_context>
chip_gen: v7x
topology: tpu7x:2x2x1
jax: 0.10.0
libtpu: 0.0.40
codegen_flags: <defaults>
</compile_context>

<pallas_src>
import functools

import jax
import jax.numpy as jnp
from jax import lax
from jax.experimental import pallas as pl
from jax.experimental.pallas import tpu as pltpu

_LANES = 128
_SUBLANES = 8


def _detect_vmem_bytes():
    """Physical VMEM per core; conservative 64 MiB (v7x) fallback."""
    try:
        info = pltpu.get_tpu_info()
        v = getattr(info, "vmem_capacity_bytes", None)
        if v:
            return int(v)
    except Exception:
        pass
    return 64 * 1024 * 1024


def _detect_num_cores():
    """TensorCores per chip; conservative fallback of 1 (v5e/v6e)."""
    try:
        info = pltpu.get_tpu_info()
        for name in ("num_cores", "tensorcore_count", "num_tensorcores",
                     "core_count"):
            v = getattr(info, name, None)
            if v:
                return int(v)
    except Exception:
        pass
    return 1


def _l2mae_kernel(x_ref, y_ref, o_ref, acc_ref, *, tg, nb, nbt, g_total,
                  ragged, dup):
    c = pl.program_id(0)          # core / parallel split
    i = pl.program_id(1)          # reduction step within this split

    @pl.when(i == 0)
    def _():
        acc_ref[...] = jnp.zeros_like(acc_ref)

    x = x_ref[...].astype(jnp.float32)          # (D, tg, 128)
    y = y_ref[...].astype(jnp.float32)
    d = x - y
    ncomp = d.shape[0]
    sq = d[0] * d[0]                            # (tg, 128), lane-dense
    for k in range(1, ncomp):
        sq = sq + d[k] * d[k]
    dist = jnp.sqrt(sq)                         # (tg, 128)

    def accumulate(v):
        # Tree-add the (tg, 128) tile down to one (8, 128) vreg (pure VALU),
        # then a single vreg add into the persistent accumulator.
        part = jnp.sum(v.reshape(tg // _SUBLANES, _SUBLANES, _LANES), axis=0)
        acc_ref[...] += part

    if ragged or dup:
        blk = c * nb + i                        # logical block index along G
        edge = nbt - 1
        interior_limit = edge if ragged else nbt

        @pl.when(blk < interior_limit)
        def _():
            accumulate(dist)                    # interior block: no mask work

        if ragged:
            # Ragged edge block: groups >= g_total are OOB garbage in VMEM;
            # one gated iota/compare/select, only on this block.
            @pl.when(blk == edge)
            def _():
                row = lax.broadcasted_iota(jnp.int32, (tg, _LANES), 0)
                keep = (edge * tg + row) < g_total
                accumulate(jnp.where(keep, dist, 0.0))
        # blk >= nbt (clamped duplicate of the 2-way split) contributes nothing.
    else:
        # Fast path: zero-padded tail already contributes 0 to the sum.
        accumulate(dist)

    @pl.when(i == pl.num_programs(1) - 1)
    def _():
        o_ref[0, 0] = jnp.sum(acc_ref[...])     # single cross-lane reduce


def l2_mae_loss(inp, tgt, reduction="mean", *, max_groups_per_block=None,
                num_cores=None, component_major=False):
    assert reduction in ("mean", "sum")
    assert inp.shape == tgt.shape

    if component_major:
        # Producer already supplies a component-major (D, N) layout: no
        # transpose copy at all.
        D = inp.shape[0]
        xt = inp.reshape(D, -1)
        yt = tgt.reshape(D, -1)
    else:
        D = inp.shape[-1]
        xt = inp.reshape(-1, D).T               # (D, N); one fused copy
        yt = tgt.reshape(-1, D).T
    N = xt.shape[1]
    assert N < 2**31, "int32 index math inside the kernel"

    vmem_bytes = _detect_vmem_bytes()
    if max_groups_per_block is None:
        # 128 MiB VMEM chips (v5e/v6e): tg=4096; 64 MiB (v7x): tg=2048.
        max_groups_per_block = 4096 if vmem_bytes >= 96 * 1024 * 1024 else 2048
    if num_cores is None:
        num_cores = _detect_num_cores()

    # 128-row groups, rounded up to a multiple of 8 (sublane packing).
    G = pl.cdiv(N, _LANES)
    G = ((G + _SUBLANES - 1) // _SUBLANES) * _SUBLANES
    n_pad = G * _LANES - N                      # <= 1023 rows, zero-filled
    if n_pad:
        xt = jnp.pad(xt, ((0, 0), (0, n_pad)))
        yt = jnp.pad(yt, ((0, 0), (0, n_pad)))
    x3 = xt.reshape(D, G, _LANES)               # trivial minor-dim reshape
    y3 = yt.reshape(D, G, _LANES)

    tg = min(max_groups_per_block, G)           # multiple of 8 (or full G)
    assert tg % _SUBLANES == 0
    nbt = pl.cdiv(G, tg)                        # total row-blocks
    nc = 2 if (num_cores >= 2 and nbt >= 2) else 1
    nb = pl.cdiv(nbt, nc)                       # row-blocks per split

    ragged = (G % tg) != 0                      # edge block overhangs the array
    dup = (nc * nb) > nbt                       # clamped duplicate block exists

    def in_map(c, i):
        # Clamp so the DMA never reads past the array; the duplicated block is
        # skipped inside the kernel.
        return (0, jnp.minimum(c * nb + i, nbt - 1), 0)

    kernel = functools.partial(_l2mae_kernel, tg=tg, nb=nb, nbt=nbt,
                               g_total=G, ragged=ragged, dup=dup)

    vmem_limit = (64 if vmem_bytes >= 96 * 1024 * 1024 else 48) * 1024 * 1024

    partials = pl.pallas_call(
        kernel,
        out_shape=jax.ShapeDtypeStruct((1, nc), jnp.float32),
        grid_spec=pltpu.PrefetchScalarGridSpec(
            num_scalar_prefetch=0,
            grid=(nc, nb),
            in_specs=[
                pl.BlockSpec((D, tg, _LANES), in_map),
                pl.BlockSpec((D, tg, _LANES), in_map),
            ],
            out_specs=pl.BlockSpec(
                (1, 1), lambda c, i: (0, c),
                memory_space=pltpu.MemorySpace.SMEM),
            scratch_shapes=[pltpu.VMEM((_SUBLANES, _LANES), jnp.float32)],
        ),
        compiler_params=pltpu.CompilerParams(
            dimension_semantics=("parallel", "arbitrary"),
            vmem_limit_bytes=vmem_limit,
        ),
    )(x3, y3)

    total = jnp.sum(partials)
    if reduction == "mean":
        total = total / jnp.float32(N)
    return total


def _reference(inp, tgt, reduction):
    d = jnp.sqrt(jnp.sum((inp - tgt) ** 2, axis=-1))
    return jnp.mean(d) if reduction == "mean" else jnp.sum(d)


if __name__ == "__main__":
    key = jax.random.PRNGKey(0)
    ks = jax.random.split(key, 4)

    # Typical L2MAE use-case: per-atom force vectors (n_atoms, 3).
    n_atoms, dim = 256, 3
    inp = jax.random.normal(ks[0], (n_atoms, dim), dtype=jnp.float32)
    tgt = jax.random.normal(ks[1], (n_atoms, dim), dtype=jnp.float32)

    loss_mean = jax.block_until_ready(l2_mae_loss(inp, tgt, reduction="mean"))
    loss_sum = jax.block_until_ready(l2_mae_loss(inp, tgt, reduction="sum"))
    assert jnp.allclose(loss_mean, _reference(inp, tgt, "mean"), rtol=1e-5, atol=1e-5)
    assert jnp.allclose(loss_sum, _reference(inp, tgt, "sum"), rtol=1e-5, atol=1e-5)

    # Multi-block grid (G=40, tg=8 -> 5 blocks, evenly divided: mask-free path).
    n2 = 5000
    inp2 = jax.random.normal(ks[2], (n2, dim), dtype=jnp.float32)
    tgt2 = jax.random.normal(ks[3], (n2, dim), dtype=jnp.float32)
    lm2 = jax.block_until_ready(
        l2_mae_loss(inp2, tgt2, reduction="mean", max_groups_per_block=8))
    ls2 = jax.block_until_ready(
        l2_mae_loss(inp2, tgt2, reduction="sum", max_groups_per_block=8))
    assert jnp.allclose(lm2, _reference(inp2, tgt2, "mean"), rtol=1e-5, atol=1e-5)
    assert jnp.allclose(ls2, _reference(inp2, tgt2, "sum"), rtol=1e-4, atol=1e-4)

    # Ragged edge block (G=40, tg=16 -> 3 blocks; last block masked under pl.when).
    lm3 = jax.block_until_ready(
        l2_mae_loss(inp2, tgt2, reduction="mean", max_groups_per_block=16))
    assert jnp.allclose(lm3, _reference(inp2, tgt2, "mean"), rtol=1e-5, atol=1e-5)

    # Forced 2-way split with odd block count (exercises the clamped-duplicate
    # skip; on a single-TC chip the "parallel" axis simply runs serially).
    lm4 = jax.block_until_ready(
        l2_mae_loss(inp2, tgt2, reduction="mean", max_groups_per_block=8,
                    num_cores=2))
    assert jnp.allclose(lm4, _reference(inp2, tgt2, "mean"), rtol=1e-5, atol=1e-5)

    print("KERNEL_OK")
</pallas_src>

<mosaic_0001>
module attributes {stable_mosaic.version = 11 : i64} {
  func.func @_l2mae_kernel(%arg0: i32, %arg1: i32, %arg2: memref<3x8x128xf32, #tpu.memory_space<vmem>>, %arg3: memref<3x8x128xf32, #tpu.memory_space<vmem>>, %arg4: memref<1x1xf32, #tpu.memory_space<smem>>, %arg5: memref<8x128xf32, #tpu.memory_space<vmem>>) attributes {dimension_semantics = [#tpu.dimension_semantics<parallel>, #tpu.dimension_semantics<arbitrary>], iteration_bounds = array<i64: 1, 1>, scalar_prefetch = 0 : i64, scratch_operands = 1 : i64, tpu.core_type = #tpu.core_type<tc>, window_params = [{transform_indices = @transform_0, window_bounds = array<i64: 3, 8, 128>}, {transform_indices = @transform_1, window_bounds = array<i64: 3, 8, 128>}, {transform_indices = @transform_2, window_bounds = array<i64: 1, 1>}]} {
    %c0_i32 = arith.constant 0 : i32
    %0 = arith.cmpi eq, %arg1, %c0_i32 : i32
    %1 = arith.extui %0 : i1 to i32
    %c0_i32_0 = arith.constant 0 : i32
    %2 = arith.cmpi ne, %1, %c0_i32_0 : i32
    scf.if %2 {
      %cst_12 = arith.constant 0.000000e+00 : f32
      %32 = vector.broadcast %cst_12 : f32 to vector<8x128xf32>
      %c0_13 = arith.constant 0 : index
      %c0_14 = arith.constant 0 : index
      %33 = vector.load %arg5[%c0_13, %c0_14] : memref<8x128xf32, #tpu.memory_space<vmem>>, vector<8x128xf32>
      tpu.vector_store %arg5[%c0_13, %c0_14], %32 {strides = array<i32>} : memref<8x128xf32, #tpu.memory_space<vmem>>, vector<8x128xf32>,
    } else {
    }
    %c0 = arith.constant 0 : index
    %c0_1 = arith.constant 0 : index
    %c0_2 = arith.constant 0 : index
    %3 = vector.load %arg2[%c0, %c0_1, %c0_2] : memref<3x8x128xf32, #tpu.memory_space<vmem>>, vector<3x8x128xf32>
    %c0_3 = arith.constant 0 : index
    %c0_4 = arith.constant 0 : index
    %c0_5 = arith.constant 0 : index
    %4 = vector.load %arg3[%c0_3, %c0_4, %c0_5] : memref<3x8x128xf32, #tpu.memory_space<vmem>>, vector<3x8x128xf32>
    %5 = arith.subf %3, %4 : vector<3x8x128xf32>
    %6 = vector.extract_strided_slice %5 {offsets = [0, 0, 0], sizes = [1, 8, 128], strides = [1, 1, 1]} : vector<3x8x128xf32> to vector<1x8x128xf32>
    %7 = vector.shape_cast %6 : vector<1x8x128xf32> to vector<8x128xf32>
    %8 = vector.extract_strided_slice %5 {offsets = [0, 0, 0], sizes = [1, 8, 128], strides = [1, 1, 1]} : vector<3x8x128xf32> to vector<1x8x128xf32>
    %9 = vector.shape_cast %8 : vector<1x8x128xf32> to vector<8x128xf32>
    %10 = arith.mulf %7, %9 : vector<8x128xf32>
    %11 = vector.extract_strided_slice %5 {offsets = [1, 0, 0], sizes = [1, 8, 128], strides = [1, 1, 1]} : vector<3x8x128xf32> to vector<1x8x128xf32>
    %12 = vector.shape_cast %11 : vector<1x8x128xf32> to vector<8x128xf32>
    %13 = vector.extract_strided_slice %5 {offsets = [1, 0, 0], sizes = [1, 8, 128], strides = [1, 1, 1]} : vector<3x8x128xf32> to vector<1x8x128xf32>
    %14 = vector.shape_cast %13 : vector<1x8x128xf32> to vector<8x128xf32>
    %15 = arith.mulf %12, %14 : vector<8x128xf32>
    %16 = arith.addf %10, %15 : vector<8x128xf32>
    %17 = vector.extract_strided_slice %5 {offsets = [2, 0, 0], sizes = [1, 8, 128], strides = [1, 1, 1]} : vector<3x8x128xf32> to vector<1x8x128xf32>
    %18 = vector.shape_cast %17 : vector<1x8x128xf32> to vector<8x128xf32>
    %19 = vector.extract_strided_slice %5 {offsets = [2, 0, 0], sizes = [1, 8, 128], strides = [1, 1, 1]} : vector<3x8x128xf32> to vector<1x8x128xf32>
    %20 = vector.shape_cast %19 : vector<1x8x128xf32> to vector<8x128xf32>
    %21 = arith.mulf %18, %20 : vector<8x128xf32>
    %22 = arith.addf %16, %21 : vector<8x128xf32>
    %23 = math.sqrt %22 : vector<8x128xf32>
    %24 = vector.shape_cast %23 : vector<8x128xf32> to vector<1x8x128xf32>
    %cst = arith.constant dense<0.000000e+00> : vector<8x128xf32>
    %25 = vector.multi_reduction <add>, %24, %cst [0] : vector<1x8x128xf32> to vector<8x128xf32>
    %c0_6 = arith.constant 0 : index
    %c0_7 = arith.constant 0 : index
    %26 = vector.load %arg5[%c0_6, %c0_7] : memref<8x128xf32, #tpu.memory_space<vmem>>, vector<8x128xf32>
    %27 = arith.addf %26, %25 : vector<8x128xf32>
    %c0_8 = arith.constant 0 : index
    %c0_9 = arith.constant 0 : index
    %28 = vector.load %arg5[%c0_8, %c0_9] : memref<8x128xf32, #tpu.memory_space<vmem>>, vector<8x128xf32>
    tpu.vector_store %arg5[%c0_8, %c0_9], %27 {strides = array<i32>} : memref<8x128xf32, #tpu.memory_space<vmem>>, vector<8x128xf32>,
    %c0_i32_10 = arith.constant 0 : i32
    %29 = arith.cmpi eq, %arg1, %c0_i32_10 : i32
    %30 = arith.extui %29 : i1 to i32
    %c0_i32_11 = arith.constant 0 : i32
    %31 = arith.cmpi ne, %30, %c0_i32_11 : i32
    scf.if %31 {
      %c0_12 = arith.constant 0 : index
      %c0_13 = arith.constant 0 : index
      %32 = vector.load %arg5[%c0_12, %c0_13] : memref<8x128xf32, #tpu.memory_space<vmem>>, vector<8x128xf32>
      %33 = vector.shape_cast %32 : vector<8x128xf32> to vector<1x8x128xf32>
      %cst_14 = arith.constant dense<0.000000e+00> : vector<1xf32>
      %34 = vector.multi_reduction <add>, %33, %cst_14 [1, 2] : vector<1x8x128xf32> to vector<1xf32>
      %35 = vector.shape_cast %34 : vector<1xf32> to vector<1x1x1xf32>
      %36 = vector.extract %35[0, 0, 0] : f32 from vector<1x1x1xf32>
      %c0_15 = arith.constant 0 : index
      %c0_16 = arith.constant 0 : index
      %37 = memref.load %arg4[%c0_15, %c0_16] : memref<1x1xf32, #tpu.memory_space<smem>>
      memref.store %36, %arg4[%c0_15, %c0_16] : memref<1x1xf32, #tpu.memory_space<smem>>
    } else {
    }
    return
  }
  func.func @transform_0(%arg0: i32, %arg1: i32) -> (i32, i32, i32) {
    %c1_i32 = arith.constant 1 : i32
    %0 = arith.muli %arg0, %c1_i32 : i32
    %1 = arith.addi %0, %arg1 : i32
    %c0_i32 = arith.constant 0 : i32
    %2 = arith.minsi %1, %c0_i32 : i32
    %c0_i32_0 = arith.constant 0 : i32
    %c0_i32_1 = arith.constant 0 : i32
    %c0_i32_2 = arith.constant 0 : i32
    return %c0_i32_0, %2, %c0_i32_1 : i32, i32, i32
  }
  func.func @transform_1(%arg0: i32, %arg1: i32) -> (i32, i32, i32) {
    %c1_i32 = arith.constant 1 : i32
    %0 = arith.muli %arg0, %c1_i32 : i32
    %1 = arith.addi %0, %arg1 : i32
    %c0_i32 = arith.constant 0 : i32
    %2 = arith.minsi %1, %c0_i32 : i32
    %c0_i32_0 = arith.constant 0 : i32
    %c0_i32_1 = arith.constant 0 : i32
    %c0_i32_2 = arith.constant 0 : i32
    return %c0_i32_0, %2, %c0_i32_1 : i32, i32, i32
  }
  func.func @transform_2(%arg0: i32, %arg1: i32) -> (i32, i32) {
    %c0_i32 = arith.constant 0 : i32
    %c0_i32_0 = arith.constant 0 : i32
    return %c0_i32, %arg0 : i32, i32
  }
}

</mosaic_0001>

<bundles_post_ra>
// kernel: tpu_custom_call.1
= control target key start
LH: loop header
LB: loop body
LE: loop exit
PB: predicated region body
PF: predicated region fallthrough
CT: control target
= control target key end

     0   :  { %7 = vsyncpa [#allocation4], 0  ;;  %s245_s0 = inlined_call_operand.hbm [shape: f32[3,8,128], index: 0, kind: input, shape index: {}]   ;;  %s246_s1 = inlined_call_operand.hbm [shape: f32[3,8,128], index: 1, kind: input, shape index: {}]   ;;  %s247_s2 = inlined_call_operand.hbm [shape: f32[1,1], index: 2, kind: output, shape index: {}]  }
   0x1   :  { %8 = vsyncpa [#allocation7], 0 }
   0x2   :  { %9 = vsyncpa [#allocation5], 0  ;;  %s189_s9 = smov [#allocation3]   ;;  %s129_s13 = scalar_lea.hbm %s245_s0, 384 }
   0x3   :  { %s20_s10 = sshll.u32 %s189_s9, 4  ;;  %p130_p0 = scmp.ne.s32.totalorder %s245_s0, %s129_s13  ;;  %s21_s10 = int_to_ptr.vmem [resolvable:$true] %s20_s10 }
   0x4   :  { %p133_p1 = scmp.lt.u32.totalorder %s129_s13, %s245_s0 }
   0x6   :  { %p135_p2 = pnand %p133_p1, %p130_p0 }
   0x8   :  { %138 = shalt.err (!%p135_p2)
}
   0x9   :  { %s139_s18 = scalar_lea.vmem %s21_s10, 384  ;;  %p144_p4 = scmp.lt.s32.totalorder %s21_s10, %s21_s10 }
   0xa   :  { %p140_p3 = scmp.ne.s32.totalorder %s21_s10, %s139_s18  ;;  %p145_p5 = scmp.lt.s32.totalorder %s139_s18, %s139_s18 }
   0xc   :  { %p146_p6 = por %p145_p5, %p144_p4 }
   0xe   :  { %p147_p7 = pnand %p146_p6, %p140_p3 }
  0x10   :  { %150 = shalt.err (!%p147_p7)
}
  0x11   :  { %s190_s19 = smov 128   ;;  %s191_s20 = smov 8  }
  0x12   :  { %26 = dma.hbm_to_vmem [thread:$0]  %s245_s0, 384, %s21_s10, [#allocation4], %s190_s19, %s190_s19, %s191_s20  }
  0x13   :  { %s192_s23 = smov [#allocation6]   ;;  %s151_s27 = scalar_lea.hbm %s246_s1, 384 }
  0x14   :  { %s37_s24 = sshll.u32 %s192_s23, 4  ;;  %p152_p8 = scmp.ne.s32.totalorder %s246_s1, %s151_s27  ;;  %s38_s24 = int_to_ptr.vmem [resolvable:$true] %s37_s24 }
  0x15   :  { %p155_p9 = scmp.lt.u32.totalorder %s151_s27, %s246_s1 }
  0x17   :  { %p157_p10 = pnand %p155_p9, %p152_p8 }
  0x19   :  { %160 = shalt.err (!%p157_p10)
}
  0x1a   :  { %s161_s4 = scalar_lea.vmem %s38_s24, 384  ;;  %p166_p12 = scmp.lt.s32.totalorder %s38_s24, %s38_s24 }
  0x1b   :  { %p162_p11 = scmp.ne.s32.totalorder %s38_s24, %s161_s4  ;;  %p167_p13 = scmp.lt.s32.totalorder %s161_s4, %s161_s4 }
  0x1d   :  { %p168_p0 = por %p167_p13, %p166_p12 }
  0x1f   :  { %p169_p1 = pnand %p168_p0, %p162_p11 }
  0x21   :  { %172 = shalt.err (!%p169_p1)
}
  0x22   :  { %43 = dma.hbm_to_vmem [thread:$0]  %s246_s1, 384, %s38_s24, [#allocation7], %s190_s19, %s190_s19, %s191_s20  }
  0x23   :  { %183 = dma.done.wait [#allocation4], 384  }
  0x24   :  { %184 = vsyncadd [#allocation4], 4294966912 }
  0x25   :  { %185 = dma.done.wait [#allocation7], 384  }
  0x26   :  { %186 = vsyncadd [#allocation7], 4294966912  ;;  %v61_v0 = vld [vmem:[#allocation3] sm:$0xff]  ;;  %v62_v1 = vld [vmem:[#allocation3 + $0x8] sm:$0xff]  ;;  %s173_s8 = scalar_lea.hbm %s247_s2, 16 }
  0x27   :  { %v63_v2 = vld [vmem:[#allocation3 + $0x10] sm:$0xff]  ;;  %v64_v3 = vld [vmem:[#allocation6] sm:$0xff]  ;;  %v65_v4 = vld [vmem:[#allocation6 + $0x8] sm:$0xff]  ;;  %p174_p2 = scmp.ne.s32.totalorder %s247_s2, %s173_s8  ;;  %p177_p3 = scmp.lt.u32.totalorder %s173_s8, %s247_s2 }
  0x28   :  { %v66_v5 = vld [vmem:[#allocation6 + $0x10] sm:$0xff]  ;;  %v67_v6 = vsub.f32 %v61_v0, %v64_v3  ;;  %v68_v7 = vsub.f32 %v62_v1, %v65_v4 }
  0x29   :  { %v69_v8 = vsub.f32 %v63_v2, %v66_v5  ;;  %p179_p4 = pnand %p177_p3, %p174_p2 }
  0x2a   :  { %v70_v9 = vmul.f32 %v67_v6, %v67_v6  ;;  %v71_v10 = vmul.f32 %v68_v7, %v68_v7 }
  0x2b   :  { %v73_v11 = vmul.f32 %v69_v8, %v69_v8 }
  0x2c   :  { %v72_v12 = vadd.f32 %v71_v10, %v70_v9 }
  0x2e   :  { %v74_v13 = vadd.f32 %v73_v11, %v72_v12 }
  0x30   :  { %127 = vrsqrt.f32 %v74_v13  ;;  %vm77_vm0 = vcmp.eq.f32.partialorder %v74_v13, inf  ;;  %v80_v15 = vand.u32 2147483648, %v74_v13  ;;  %vm79_vm1 = vcmp.eq.f32.partialorder %v74_v13, 0.0 }
  0x3a   :  { %v128_v14 = vpop.eup %127 }
  0x3b   :  { %v76_v16 = vmul.f32 %v128_v14, %v74_v13 }
  0x3d   :  { %v78_v17 = vsel %vm77_vm0, %v74_v13, %v76_v16 }
  0x3e   :  { %v81_v18 = vsel %vm79_vm1, %v80_v15, %v78_v17 }
  0x3f   :  { %90 = vadd.xlane.f32.xlu0 %v81_v18 }
  0xcc   :  { %v91_v19 = vpop.xlane.xlu0 %90 }
  0xcd   :  { %v92_v20 = vrot.slane %v91_v19, 4 }
  0xcf   :  { %v93_v21 = vadd.f32 %v92_v20, %v91_v19 }
  0xd1   :  { %v94_v22 = vrot.slane %v93_v21, 2 }
  0xd3   :  { %v95_v23 = vadd.f32 %v94_v22, %v93_v21 }
  0xd5   :  { %v96_v24 = vrot.slane %v95_v23, 1 }
  0xd7   :  { %v97_v25 = vadd.f32 %v96_v24, %v95_v23 }
  0xd9   :  { %120 = vpush %v97_v25 }
 0x10a   :  { %s121_s1 = spop %120 }
 0x10b   :  { %100 = sst [smem:[#allocation8]] %s121_s1 }
 0x10c   :  { %182 = shalt.err (!%p179_p4)
}
 0x10d   :  { %s193_s13 = smov [#allocation8]  }
 0x10e   :  { %108 = dma.smem_to_hbm %s193_s13, 16, %s247_s2, [#allocation5]  }
 0x10f   :  { %187 = dma.done.wait [#allocation5], 16  }
 0x110   :  { %188 = vsyncadd [#allocation5], 4294967280 }
 0x111   :  { %112 = sfence }
 0x112   :  { %113 = vsyncpa [#allocation4], 1 }
 0x113   :  { %114 = vsyncpa [#allocation7], 1 }
 0x114   :  { %115 = vsyncpa [#allocation5], 1 }

</bundles_post_ra>
